<compile_context>
chip_gen: v7x
topology: tpu7x:2x2x1
jax: 0.10.0
libtpu: 0.0.40
codegen_flags: <defaults>
</compile_context>

<pallas_src>
import jax
import jax.numpy as jnp
import numpy as np
from jax.experimental import pallas as pl
from jax.experimental.pallas import tpu as pltpu


def comp_kernel(xT_ref, w_ref, wbdT_ref, hidT_ref, outT_ref):
    """One lane-tile of CompModel.forward, fully fused.

    xT_ref   : (T, tn)     VMEM  -- x^T tile (rows = time, lanes = 2N)
    w_ref    : (3H, T)     VMEM  -- Linear weight (out_features, in_features)
    wbdT_ref : (3T, 3H)    VMEM  -- block-diagonal transposed weight
    hidT_ref : (3H, tn)    VMEM  -- hidden^T  (== (x2 @ W^T)^T)
    outT_ref : (3T, tn)    VMEM  -- output^T  (== (hid @ W_bd)^T), block k in
                                    rows [k*T, (k+1)*T)
    """
    xT = xT_ref[...]                                       # (T, tn)
    w = w_ref[...]                                         # (3H, T)

    # hid^T = W @ x^T   -> single MXU pass over the folded (type x neuron) axis
    hidT = jnp.dot(w, xT, preferred_element_type=jnp.float32)      # (3H, tn)
    hidT_ref[...] = hidT

    # out^T = W_bd^T @ hid^T   -> one matmul instead of 3 tiny 4-lane-slice ones
    outT_ref[...] = jnp.dot(wbdT_ref[...], hidT,
                            preferred_element_type=jnp.float32)    # (3T, tn)


def comp_model_forward(x, w, hidden_size, *, lane_tile=512):
    """Reproduces CompModel.forward's (hidden, output, matrices) structure.

    x : (2, N, T)  float  -- (type x neuron x time)
    w : (3H, T)    float  -- Linear weight (out_features, in_features)
    """
    two, N, T = x.shape
    H = hidden_size
    H3 = w.shape[0]
    assert two == 2 and H3 == 3 * H and w.shape[1] == T

    x = x.astype(jnp.float32)
    w = w.astype(jnp.float32)

    # Fold the type axis into rows, then put that axis on lanes (transpose).
    rows = 2 * N
    tn = min(lane_tile, max(128, pl.cdiv(rows, 128) * 128))   # lane-tile, %128
    padded = pl.cdiv(rows, tn) * tn
    x2 = x.reshape(rows, T)
    if padded > rows:
        x2 = jnp.pad(x2, ((0, padded - rows), (0, 0)))
    xT = x2.T                                                  # (T, padded)

    # Block-diagonal transposed weight: wbdT[kT:(k+1)T, kH:(k+1)H] = W_k^T.
    wbdT = jnp.zeros((3 * T, 3 * H), dtype=jnp.float32)
    for k in range(3):
        wbdT = wbdT.at[k * T:(k + 1) * T, k * H:(k + 1) * H].set(
            w[k * H:(k + 1) * H, :].T)

    hidT, outT = pl.pallas_call(
        comp_kernel,
        out_shape=(
            jax.ShapeDtypeStruct((3 * H, padded), jnp.float32),
            jax.ShapeDtypeStruct((3 * T, padded), jnp.float32),
        ),
        grid=(padded // tn,),
        in_specs=[
            pl.BlockSpec((T, tn), lambda i: (0, i)),        # x^T lane tile
            pl.BlockSpec((3 * H, T), lambda i: (0, 0)),     # W (resident)
            pl.BlockSpec((3 * T, 3 * H), lambda i: (0, 0)), # W_bd^T (resident)
        ],
        out_specs=(
            pl.BlockSpec((3 * H, tn), lambda i: (0, i)),
            pl.BlockSpec((3 * T, tn), lambda i: (0, i)),
        ),
        compiler_params=pltpu.CompilerParams(
            dimension_semantics=("parallel",)),             # megacore on v7x
    )(xT, w, wbdT)

    # Glue (plain JAX): transpose back, drop padding, rebuild the module's
    # nested-tuple return structure.
    hid = hidT[:, :rows].T.reshape(2, N, 3 * H)             # (2, N, 3H)
    out = outT[:, :rows].T.reshape(2, N, 3 * T)             # (2, N, 3T)

    hidden = tuple(
        tuple(hid[b, :, k * H:(k + 1) * H] for k in range(3)) for b in range(2))
    output = tuple(
        tuple(out[b, :, k * T:(k + 1) * T] for k in range(3)) for b in range(2))
    v_weight = w.T                                          # (T, 3H)
    matrices = tuple(v_weight[:, k * H:(k + 1) * H] for k in range(3))
    return hidden, output, matrices


def make_weight(key, input_size, hidden_size):
    """Deterministic stand-in for orthogonal(Linear) + Sphere parametrization:
    rows of W (shape (3H, T)) are orthonormal, then row-normalized (no-op)."""
    w0 = jax.random.normal(key, (input_size, 3 * hidden_size), dtype=jnp.float32)
    q, _ = jnp.linalg.qr(w0)          # (T, 3H) orthonormal columns
    w = q.T                           # (3H, T) orthonormal rows
    w = w / jnp.linalg.norm(w, axis=-1, keepdims=True)   # Sphere(dim=-1)
    return w


if __name__ == "__main__":
    # NOTE: at these tiny sizes a fused XLA graph would beat any kernel; this
    # layout is chosen so the same kernel scales when N (neurons) grows large.
    input_size = 16    # time length of a trial  (T)
    hidden_size = 4    # low-D representation    (H), 3H = 12 <= T
    n_neurons = 8      # neuron axis             (N)

    key = jax.random.PRNGKey(0)
    kx, kw = jax.random.split(key)

    x = jax.random.normal(kx, (2, n_neurons, input_size), dtype=jnp.float32)
    w = make_weight(kw, input_size, hidden_size)

    hidden, output, matrices = comp_model_forward(x, w, hidden_size)
    jax.block_until_ready((hidden, output, matrices))

    # correctness check vs. plain-JAX reference of the PyTorch forward
    H = hidden_size
    for b in range(2):
        xv_ref = x[b] @ w.T                                  # (N, 3H)
        for k in range(3):
            hk_ref = xv_ref[:, k * H:(k + 1) * H]            # (N, H)
            ok_ref = hk_ref @ w[k * H:(k + 1) * H, :]        # (N, T)
            np.testing.assert_allclose(np.asarray(hidden[b][k]),
                                       np.asarray(hk_ref),
                                       rtol=1e-5, atol=1e-5)
            np.testing.assert_allclose(np.asarray(output[b][k]),
                                       np.asarray(ok_ref),
                                       rtol=1e-5, atol=1e-5)
            np.testing.assert_allclose(np.asarray(matrices[k]),
                                       np.asarray(w.T[:, k * H:(k + 1) * H]),
                                       rtol=1e-6, atol=1e-6)

    print("KERNEL_OK")
</pallas_src>

<mosaic_0001>
module attributes {stable_mosaic.version = 11 : i64} {
  func.func @comp_kernel(%arg0: i32, %arg1: memref<16x128xf32, #tpu.memory_space<vmem>>, %arg2: memref<12x16xf32, #tpu.memory_space<vmem>>, %arg3: memref<48x12xf32, #tpu.memory_space<vmem>>, %arg4: memref<12x128xf32, #tpu.memory_space<vmem>>, %arg5: memref<48x128xf32, #tpu.memory_space<vmem>>) attributes {dimension_semantics = [#tpu.dimension_semantics<parallel>], iteration_bounds = array<i64: 1>, scalar_prefetch = 0 : i64, scratch_operands = 0 : i64, tpu.core_type = #tpu.core_type<tc>, window_params = [{transform_indices = @transform_0, window_bounds = array<i64: 16, 128>}, {pipeline_mode = #tpu.pipeline_mode<synchronous>, transform_indices = @transform_1, window_bounds = array<i64: 12, 16>}, {pipeline_mode = #tpu.pipeline_mode<synchronous>, transform_indices = @transform_2, window_bounds = array<i64: 48, 12>}, {transform_indices = @transform_3, window_bounds = array<i64: 12, 128>}, {transform_indices = @transform_4, window_bounds = array<i64: 48, 128>}]} {
    %c0 = arith.constant 0 : index
    %c0_0 = arith.constant 0 : index
    %0 = vector.load %arg1[%c0, %c0_0] : memref<16x128xf32, #tpu.memory_space<vmem>>, vector<16x128xf32>
    %c0_1 = arith.constant 0 : index
    %c0_2 = arith.constant 0 : index
    %1 = vector.load %arg2[%c0_1, %c0_2] : memref<12x16xf32, #tpu.memory_space<vmem>>, vector<12x16xf32>
    %cst = arith.constant dense<0.000000e+00> : vector<12x128xf32>
    %2 = tpu.matmul %1, %0, %cst {dimension_numbers = #tpu.dot_dimension_numbers<[1], [0], [0], [1], [0, 0, 1, 1], [], []>} : vector<12x16xf32>, vector<16x128xf32>, vector<12x128xf32> -> vector<12x128xf32>
    %c0_3 = arith.constant 0 : index
    %c0_4 = arith.constant 0 : index
    %3 = vector.load %arg4[%c0_3, %c0_4] : memref<12x128xf32, #tpu.memory_space<vmem>>, vector<12x128xf32>
    tpu.vector_store %arg4[%c0_3, %c0_4], %2 {strides = array<i32>} : memref<12x128xf32, #tpu.memory_space<vmem>>, vector<12x128xf32>,
    %c0_5 = arith.constant 0 : index
    %c0_6 = arith.constant 0 : index
    %4 = vector.load %arg3[%c0_5, %c0_6] : memref<48x12xf32, #tpu.memory_space<vmem>>, vector<48x12xf32>
    %cst_7 = arith.constant dense<0.000000e+00> : vector<48x128xf32>
    %5 = tpu.matmul %4, %2, %cst_7 {dimension_numbers = #tpu.dot_dimension_numbers<[1], [0], [0], [1], [0, 0, 1, 1], [], []>} : vector<48x12xf32>, vector<12x128xf32>, vector<48x128xf32> -> vector<48x128xf32>
    %c0_8 = arith.constant 0 : index
    %c0_9 = arith.constant 0 : index
    %6 = vector.load %arg5[%c0_8, %c0_9] : memref<48x128xf32, #tpu.memory_space<vmem>>, vector<48x128xf32>
    tpu.vector_store %arg5[%c0_8, %c0_9], %5 {strides = array<i32>} : memref<48x128xf32, #tpu.memory_space<vmem>>, vector<48x128xf32>,
    return
  }
  func.func @transform_0(%arg0: i32) -> (i32, i32) {
    %c0_i32 = arith.constant 0 : i32
    %c0_i32_0 = arith.constant 0 : i32
    return %c0_i32, %arg0 : i32, i32
  }
  func.func @transform_1(%arg0: i32) -> (i32, i32) {
    %c0_i32 = arith.constant 0 : i32
    %c0_i32_0 = arith.constant 0 : i32
    %c0_i32_1 = arith.constant 0 : i32
    return %c0_i32, %c0_i32_0 : i32, i32
  }
  func.func @transform_2(%arg0: i32) -> (i32, i32) {
    %c0_i32 = arith.constant 0 : i32
    %c0_i32_0 = arith.constant 0 : i32
    %c0_i32_1 = arith.constant 0 : i32
    return %c0_i32, %c0_i32_0 : i32, i32
  }
  func.func @transform_3(%arg0: i32) -> (i32, i32) {
    %c0_i32 = arith.constant 0 : i32
    %c0_i32_0 = arith.constant 0 : i32
    return %c0_i32, %arg0 : i32, i32
  }
  func.func @transform_4(%arg0: i32) -> (i32, i32) {
    %c0_i32 = arith.constant 0 : i32
    %c0_i32_0 = arith.constant 0 : i32
    return %c0_i32, %arg0 : i32, i32
  }
}

</mosaic_0001>

<bundles_post_ra>
// kernel: tpu_custom_call.1
= control target key start
LH: loop header
LB: loop body
LE: loop exit
PB: predicated region body
PF: predicated region fallthrough
CT: control target
= control target key end

     0   :  { %10 = vsyncpa [#allocation3], 0  ;;  %vm22_vm0 = vcmask 130048   ;;  %s470_s0 = inlined_call_operand.vmem [shape: f32[16,128], index: 0, kind: input, shape index: {}]   ;;  %s471_s1 = inlined_call_operand.vmem [shape: f32[12,16], index: 1, kind: input, shape index: {}]   ;;  %s472_s2 = inlined_call_operand.vmem [shape: f32[48,12], index: 2, kind: input, shape index: {}]   ;;  %s473_s3 = inlined_call_operand.hbm [shape: f32[12,128], index: 3, kind: output, shape index: {0}]   ;;  %s474_s4 = inlined_call_operand.hbm [shape: f32[48,128], index: 4, kind: output, shape index: {1}]  }
   0x1   :  { %v18_v0 = vld [vmem:[%s470_s0] sm:$0xff]  ;;  %v19_v1 = vld [vmem:[%s470_s0 + $0x8] sm:$0xff] }
   0x2   :  { %v20_v2 = vld [vmem:[%s471_s1] sm:$0xff]  ;;  %v309_v3 = vpack.c.bf16 %v19_v1, %v18_v0 }
   0x3   :  { %293 = vmatprep.mubr.msk.f32.mxu0 %vm22_vm0, %v20_v2 }
   0x4   :  { %11 = vsyncpa [#allocation5], 0  ;;  %310 = vmatprep.subr.bf16.mxu0 %v309_v3  ;;  %v21_v4 = vld [vmem:[%s471_s1 + $0x8] sm:$0xf]  ;;  %v108_v5 = vld [vmem:[%s472_s2 + $0x10] sm:$0xff]  ;;  %vm112_vm1 = vcmask 97280  }
   0x5   :  { %312 = vmatpush3.bf16.msra.mxu0 %v309_v3  ;;  %303 = vmatprep.mubr.msk.f32.mxu1 %vm112_vm1, %v108_v5  ;;  %v106_v6 = vld [vmem:[%s472_s2] sm:$0xff]  ;;  %vm131_vm2 = vcmask 1043456   ;;  %vm374_vm3 = vmmov 1   ;;  %v109_v10 = vld [vmem:[%s472_s2 + $0x18] sm:$0xff]  ;;  %v107_v11 = vld [vmem:[%s472_s2 + $0x8] sm:$0xff]  ;;  %s375_s7 = smov [#allocation2]  }
   0x6   :  { %vm314_vm4 = vmpackc.low %vm131_vm2, %vm374_vm3  ;;  %v110_v12 = vld [vmem:[%s472_s2 + $0x20] sm:$0xff]  ;;  %v111_v13 = vld [vmem:[%s472_s2 + $0x28] sm:$0xff]  ;;  %s241_s8 = sshll.u32 %s375_s7, 4  ;;  %s242_s8 = int_to_ptr.vmem [resolvable:$true] %s241_s8 }
   0x7   :  { %s326_s9 = scalar_lea.vmem %s242_s8, 256  ;;  %p331_p1 = scmp.lt.s32.totalorder %s242_s8, %s242_s8 }
   0x8   :  { %294 = vmatmul.mubr.msk.f32.vlgmr.msra.gmra.mrb[0].mxu0 %vm22_vm0, %v21_v4  ;;  %p327_p0 = scmp.ne.s32.totalorder %s242_s8, %s326_s9  ;;  %p332_p2 = scmp.lt.s32.totalorder %s326_s9, %s326_s9 }
   0x9   :  { %300 = vmatprep.mubr.msk.f32.mxu0 %vm112_vm1, %v106_v6 }
   0xa   :  { %p333_p3 = por %p332_p2, %p331_p1 }
   0xc   :  { %p334_p4 = pnand %p333_p3, %p327_p0 }
  0xdb   :  { %v295_v7 = vpop.f32.mrb[0].mxu0 }
  0xdc   :  { %105 = vst [vmem:[#allocation2 + $0x8] sm:$0xf] %v295_v7  ;;  %v95_v8 = vpop.f32.mrb[1].mxu0 }
  0xdd   :  { %104 = vst [vmem:[#allocation2] sm:$0xff] %v95_v8  ;;  %v313_v9 = vpack.c.bf16 %v295_v7, %v95_v8 }
  0xdf   :  { %315 = vmatprep.subr.msk.bf16.mxu0 %vm314_vm4, %v313_v9  ;;  %319 = vmatprep.subr.msk.bf16.mxu1 %vm314_vm4, %v313_v9 }
  0xe0   :  { %318 = vmatpush3.bf16.msk.msra.mxu0 %vm314_vm4, %v313_v9  ;;  %320 = vmatpush3.bf16.msk.msra.mxu1 %vm314_vm4, %v313_v9 }
  0xe3   :  { %304 = vmatmul.mubr.msk.f32.vlgmr.msra.gmra.mrb[0].mxu1 %vm112_vm1, %v109_v10  ;;  %301 = vmatmul.mubr.msk.f32.vlgmr.msra.gmra.mrb[2].mxu0 %vm112_vm1, %v107_v11 }
  0xe4   :  { %306 = vmatprep.mubr.msk.f32.mxu1 %vm112_vm1, %v110_v12 }
  0xe7   :  { %307 = vmatmul.mubr.msk.f32.gmra.mrb[2].mxu1 %vm112_vm1, %v111_v13 }
  0xe8   :  { %337 = shalt.err (!%p334_p4)
}
  0xe9   :  { %s338_s12 = scalar_lea.hbm %s473_s3, 256 }
  0xea   :  { %p339_p5 = scmp.ne.s32.totalorder %s473_s3, %s338_s12  ;;  %p342_p6 = scmp.lt.u32.totalorder %s338_s12, %s473_s3 }
  0xec   :  { %p344_p7 = pnand %p342_p6, %p339_p5 }
  0xee   :  { %347 = shalt.err (!%p344_p7)
}
  0xef   :  { %s376_s16 = smov 128   ;;  %s377_s17 = smov 8  }
  0xf0   :  { %247 = dma.vmem_to_hbm [thread:$0]  %s242_s8, 256, %s473_s3, [#allocation3], %s376_s16, %s376_s16, %s377_s17  }
  0xf1   :  { %s378_s20 = smov [#allocation4]  }
  0xf2   :  { %s253_s21 = sshll.u32 %s378_s20, 4  ;;  %s254_s21 = int_to_ptr.vmem [resolvable:$true] %s253_s21 }
  0xf3   :  { %s348_s22 = scalar_lea.vmem %s254_s21, 768  ;;  %p353_p9 = scmp.lt.s32.totalorder %s254_s21, %s254_s21 }
  0xf4   :  { %p349_p8 = scmp.ne.s32.totalorder %s254_s21, %s348_s22  ;;  %p354_p10 = scmp.lt.s32.totalorder %s348_s22, %s348_s22 }
  0xf6   :  { %p355_p11 = por %p354_p10, %p353_p9 }
  0xf8   :  { %p356_p12 = pnand %p355_p11, %p349_p8 }
 0x1b6   :  { %v305_v14 = vpop.f32.mrb[0].mxu1  ;;  %v302_v15 = vpop.f32.mrb[2].mxu0 }
 0x1b7   :  { %233 = vst [vmem:[#allocation4 + $0x18] sm:$0xff] %v305_v14  ;;  %v211_v16 = vpop.f32.mrb[1].mxu1  ;;  %231 = vst [vmem:[#allocation4 + $0x8] sm:$0xff] %v302_v15  ;;  %v201_v17 = vpop.f32.mrb[3].mxu0 }
 0x1b8   :  { %232 = vst [vmem:[#allocation4 + $0x10] sm:$0xff] %v211_v16  ;;  %230 = vst [vmem:[#allocation4] sm:$0xff] %v201_v17 }
 0x1ba   :  { %v308_v18 = vpop.f32.mrb[2].mxu1 }
 0x1bb   :  { %235 = vst [vmem:[#allocation4 + $0x28] sm:$0xff] %v308_v18  ;;  %v221_v19 = vpop.f32.mrb[3].mxu1 }
 0x1bc   :  { %234 = vst [vmem:[#allocation4 + $0x20] sm:$0xff] %v221_v19 }
 0x1bd   :  { %359 = shalt.err (!%p356_p12)
}
 0x1be   :  { %s360_s24 = scalar_lea.hbm %s474_s4, 768 }
 0x1bf   :  { %p361_p13 = scmp.ne.s32.totalorder %s474_s4, %s360_s24  ;;  %p364_p0 = scmp.lt.u32.totalorder %s360_s24, %s474_s4 }
 0x1c1   :  { %p366_p1 = pnand %p364_p0, %p361_p13 }
 0x1c3   :  { %369 = shalt.err (!%p366_p1)
}
 0x1c4   :  { %259 = dma.vmem_to_hbm [thread:$0]  %s254_s21, 768, %s474_s4, [#allocation5], %s376_s16, %s376_s16, %s377_s17  }
 0x1c5   :  { %370 = dma.done.wait [#allocation3], 256  }
 0x1c6   :  { %371 = vsyncadd [#allocation3], 4294967040 }
 0x1c7   :  { %372 = dma.done.wait [#allocation5], 768  }
 0x1c8   :  { %373 = vsyncadd [#allocation5], 4294966528 }
 0x1c9   :  { %266 = vsyncpa [#allocation3], 1 }
 0x1ca   :  { %267 = vsyncpa [#allocation5], 1 }

</bundles_post_ra>
